<compile_context>
chip_gen: v7x
topology: tpu7x:2x2x1
jax: 0.10.0
libtpu: 0.0.40
codegen_flags: <defaults>
</compile_context>

<pallas_src>
import functools

import jax
import jax.numpy as jnp
from jax.experimental import pallas as pl
from jax.experimental.pallas import tpu as pltpu

LANE = 128                    # vreg lane width: all channel dims zero-padded to this
_MIB = 1024 * 1024


# ----------------------------------------------------------------------------
# helpers
# ----------------------------------------------------------------------------
def _zero_map(n):
    return lambda: (0,) * n


def _round_up(x, m):
    return ((x + m - 1) // m) * m


def _node_tiling(n):
    """(n_pad, tile_n) destination-row tiling for the GMM layer kernel.

    n_pad is a multiple of 128 so the (N_dst, K*N_src) adjacency is lane-dense.
    """
    if n <= 256:
        n_pad = _round_up(n, 128)
        return n_pad, n_pad                 # single block
    n_pad = _round_up(n, 256)
    return n_pad, 256                       # bf16 A tiles stay well under v7x's 64 MiB VMEM


def _nbytes(*arrs):
    return sum(int(a.size) * a.dtype.itemsize for a in arrs)


def _vmem_params(n_bytes, parallel_dims=None):
    """CompilerParams with a scoped-VMEM limit sized to the actual block footprint."""
    limit = int(min(48 * _MIB, max(16 * _MIB, 4 * n_bytes)))   # x2 double-buffer, x2 margin
    kwargs = {"vmem_limit_bytes": limit}
    if parallel_dims is not None:
        kwargs["dimension_semantics"] = parallel_dims
    return pltpu.CompilerParams(**kwargs)


# ----------------------------------------------------------------------------
# Kernel 1: node embedding + Gaussian mixture edge weights for ALL layers (fused)
# ----------------------------------------------------------------------------
def _prologue_kernel(feat_ref, we_ref, be_ref, ps_ref, wp_ref, bp_ref, mu_ref,
                     is2_ref, h_ref, gw_ref, *, L, K):
    # embedding_h: one lane-dense (N_pad, in_dim) x (in_dim, 128) matmul
    h_ref[...] = (jnp.dot(feat_ref[...], we_ref[...],
                          preferred_element_type=jnp.float32) + be_ref[...])

    # Gaussian mixture edge weights for every layer.  Contraction dims (2, pseudo_dim)
    # are tiny -> VPU broadcasts + EUP tanh/exp, keeping the MXU free.
    ps = ps_ref[...]                                      # (2, E)
    rows = []
    for l in range(L):                                    # static unroll, L tiny
        wp = wp_ref[l]                                    # (D, 2)
        u = jnp.tanh(wp[:, 0:1] * ps[0:1, :] + wp[:, 1:2] * ps[1:2, :]
                     + bp_ref[l])                         # (D, E)
        mu = mu_ref[l]                                    # (D, K)
        is2 = is2_ref[l]                                  # (D, K) == inv_sigma**2
        for k in range(K):                                # static unroll, K tiny
            diff = u - mu[:, k:k + 1]                     # direct (u-mu)^2 in f32
            rows.append(jnp.sum(diff * diff * is2[:, k:k + 1],
                                axis=0, keepdims=True))   # (1, E)
    gw_ref[...] = jnp.exp(-0.5 * jnp.concatenate(rows, axis=0))   # (L*K, E)


def _prologue(feature_p, We, be, pseudo_t, wp_all, bp_all, mu_all, is2_all,
              *, L, K, n_pad, cp):
    E = pseudo_t.shape[1]
    inputs = (feature_p, We, be, pseudo_t, wp_all, bp_all, mu_all, is2_all)
    out_shape = (jax.ShapeDtypeStruct((n_pad, cp), jnp.float32),
                 jax.ShapeDtypeStruct((L * K, E), jnp.float32))
    return pl.pallas_call(
        functools.partial(_prologue_kernel, L=L, K=K),
        out_shape=out_shape,
        in_specs=[pl.BlockSpec(x.shape, _zero_map(x.ndim)) for x in inputs],
        out_specs=tuple(pl.BlockSpec(s.shape, _zero_map(len(s.shape)))
                        for s in out_shape),
        compiler_params=_vmem_params(
            _nbytes(*inputs) + (n_pad * cp + L * K * E) * 4),
    )(*inputs)


# ----------------------------------------------------------------------------
# Kernel 2: one GMM layer (fused projection + aggregation + bias + BN + ReLU + res)
# ----------------------------------------------------------------------------
def _gmm_layer_kernel(h_ref, a_ref, wfc_ref, b_ref, scale_ref, shift_ref, o_ref,
                      *, K, cp, n_pad, tile_n, residual):
    h = h_ref[...]                                                   # (n_pad, cp) full-resident
    # single fused projection matmul: (n_pad, cp) x (cp, K*cp)
    pk = jnp.dot(h, wfc_ref[...], preferred_element_type=jnp.float32)
    a = a_ref[...]                                                   # (tile_n, K*n_pad) bf16
    # aggregation over (gaussian, src): K lane-aligned bf16 matmuls, f32 accumulation
    acc = jnp.zeros((tile_n, cp), jnp.float32)
    for k in range(K):                                               # static unroll, K tiny
        acc = acc + jnp.dot(a[:, k * n_pad:(k + 1) * n_pad],
                            pk[:, k * cp:(k + 1) * cp].astype(a.dtype),
                            preferred_element_type=jnp.float32)      # (tile_n, cp)
    acc = acc + b_ref[...]
    acc = acc * scale_ref[...] + shift_ref[...]          # folded BatchNorm (eval)
    acc = jnp.maximum(acc, 0.0)                          # ReLU
    if residual:
        start = pl.multiple_of(pl.program_id(0) * tile_n, tile_n)
        acc = acc + h_ref[pl.ds(start, tile_n), :]
    o_ref[...] = acc                                     # lane-dense (tile_n, 128) store
    # dropout == identity at inference


def _gmm_layer(h, a_cat, wfc, bias, scale, shift, *, K, cp, n_pad, tile_n, residual):
    grid = (n_pad // tile_n,)
    kern = functools.partial(_gmm_layer_kernel, K=K, cp=cp, n_pad=n_pad,
                             tile_n=tile_n, residual=residual)
    block_bytes = (n_pad * cp * 4 + tile_n * K * n_pad * 2 + cp * K * cp * 4
                   + n_pad * K * cp * 4 + 3 * cp * 4 + tile_n * cp * 4)
    return pl.pallas_call(
        kern,
        out_shape=jax.ShapeDtypeStruct((n_pad, cp), jnp.float32),
        grid=grid,
        in_specs=[
            pl.BlockSpec((n_pad, cp), lambda i: (0, 0)),            # h (full resident)
            pl.BlockSpec((tile_n, K * n_pad), lambda i: (i, 0)),    # bf16 adjacency row tile
            pl.BlockSpec((cp, K * cp), lambda i: (0, 0)),           # Wfc
            pl.BlockSpec((1, cp), lambda i: (0, 0)),                # bias
            pl.BlockSpec((1, cp), lambda i: (0, 0)),                # bn scale
            pl.BlockSpec((1, cp), lambda i: (0, 0)),                # bn shift
        ],
        out_specs=pl.BlockSpec((tile_n, cp), lambda i: (i, 0)),
        compiler_params=_vmem_params(block_bytes, parallel_dims=("parallel",)),
    )(h, a_cat, wfc, bias, scale, shift)


# ----------------------------------------------------------------------------
# Kernel 3: mean-readout pooling + MLPReadout
# ----------------------------------------------------------------------------
def _readout_kernel(pool_ref, h_ref, w0, b0, w1, b1, w2, b2, o_ref):
    hg = jnp.dot(pool_ref[...], h_ref[...], preferred_element_type=jnp.float32)
    y = jnp.maximum(jnp.dot(hg, w0[...], preferred_element_type=jnp.float32)
                    + b0[...], 0.0)
    y = jnp.maximum(jnp.dot(y, w1[...], preferred_element_type=jnp.float32)
                    + b1[...], 0.0)
    o_ref[...] = jnp.dot(y, w2[...], preferred_element_type=jnp.float32) + b2[...]


def _readout(pool, h, mlp, *, cp):
    inputs = (pool, h, mlp["W0"], mlp["b0"], mlp["W1"], mlp["b1"], mlp["W2"], mlp["b2"])
    out_shape = jax.ShapeDtypeStruct((pool.shape[0], cp), jnp.float32)
    return pl.pallas_call(
        _readout_kernel,
        out_shape=out_shape,
        in_specs=[pl.BlockSpec(x.shape, _zero_map(x.ndim)) for x in inputs],
        out_specs=pl.BlockSpec(out_shape.shape, _zero_map(2)),
        compiler_params=_vmem_params(_nbytes(*inputs)),
    )(*inputs)


# ----------------------------------------------------------------------------
# Parameter init (deterministic, synthetic) -- produces lane-padded weights
# ----------------------------------------------------------------------------
def init_params(key, in_dim, hidden_dim, out_dim, n_classes, K, dim, n_layers,
                cp=LANE):
    assert max(hidden_dim, out_dim, n_classes) <= cp
    keys = iter(jax.random.split(key, 2 + 5 * n_layers + 3))

    def dense(shape, scale):
        return scale * jax.random.normal(next(keys), shape, jnp.float32)

    def pad2(x, r, c):
        return jnp.zeros((r, c), jnp.float32).at[:x.shape[0], :x.shape[1]].set(x)

    params = {
        "n_classes": n_classes,
        "We": pad2(dense((in_dim, hidden_dim), in_dim ** -0.5), in_dim, cp),
        "be": jnp.zeros((1, cp), jnp.float32),
    }
    layer_dims = [(hidden_dim, hidden_dim)] * (n_layers - 1) + [(hidden_dim, out_dim)]
    layers = []
    for ci, co in layer_dims:
        wp = dense((2, dim), 2.0 ** -0.5)
        bp = dense((1, dim), 0.1)
        mu = dense((K, dim), 0.3)
        inv_sigma = 1.0 + 0.1 * dense((K, dim), 1.0)
        wfc = dense((ci, K * co), ci ** -0.5)
        wfc_p = jnp.zeros((cp, K * cp), jnp.float32)
        for k in range(K):
            wfc_p = wfc_p.at[:ci, k * cp:k * cp + co].set(wfc[:, k * co:(k + 1) * co])
        layers.append({
            "Wp_t": wp.T,                   # (dim, 2)
            "bp_t": bp.T,                   # (dim, 1)
            "mu_t": mu.T,                   # (dim, K)
            "isig2_t": (inv_sigma ** 2).T,  # (dim, K)
            "Wfc": wfc_p,                   # (cp, K*cp), zero outside logical block
            "bias": jnp.zeros((1, cp), jnp.float32),
            # BatchNorm1d eval-mode params / running stats (fresh-module defaults);
            # padded lanes: gamma=var=1, mean=beta=0 so padded lanes stay exactly 0.
            "gamma": jnp.ones((1, cp), jnp.float32),
            "beta": jnp.zeros((1, cp), jnp.float32),
            "mean": jnp.zeros((1, cp), jnp.float32),
            "var": jnp.ones((1, cp), jnp.float32),
            "logical_dims": (ci, co),
        })
    params["layers"] = layers
    h2, h4 = out_dim // 2, out_dim // 4
    params["mlp"] = {
        "W0": pad2(dense((out_dim, h2), out_dim ** -0.5), cp, cp),
        "b0": jnp.zeros((1, cp), jnp.float32),
        "W1": pad2(dense((h2, h4), h2 ** -0.5), cp, cp),
        "b1": jnp.zeros((1, cp), jnp.float32),
        "W2": pad2(dense((h4, n_classes), h4 ** -0.5), cp, cp),
        "b2": jnp.zeros((1, cp), jnp.float32),
    }
    return params


# ----------------------------------------------------------------------------
# Forward pass
# ----------------------------------------------------------------------------
def monet_forward(params, feature, edge_index, batch, num_graphs, *,
                  residual=True, batch_norm=True, eps=1e-5):
    N = feature.shape[0]
    row, col = edge_index[0], edge_index[1]
    E = row.shape[0]
    layers = params["layers"]
    L = len(layers)
    _, K = layers[0]["mu_t"].shape
    cp = params["We"].shape[1]
    n_pad, tile_n = _node_tiling(N)

    feature_p = jnp.pad(feature, ((0, n_pad - N), (0, 0)))

    # --- pseudo coordinates (data-dependent degree gather stays in XLA glue) ---
    deg_row = jnp.zeros((N,), jnp.float32).at[row].add(1.0)
    deg_col = jnp.zeros((N,), jnp.float32).at[col].add(1.0)
    srcs = 1.0 / jnp.sqrt(deg_row[row] + 1.0)
    dsts = 1.0 / jnp.sqrt(deg_col[col] + 1.0)
    pseudo_t = jnp.stack([srcs, dsts], axis=0)                        # (2, E)

    wp_all = jnp.stack([lp["Wp_t"] for lp in layers], axis=0)         # (L, D, 2)
    bp_all = jnp.stack([lp["bp_t"] for lp in layers], axis=0)         # (L, D, 1)
    mu_all = jnp.stack([lp["mu_t"] for lp in layers], axis=0)         # (L, D, K)
    is2_all = jnp.stack([lp["isig2_t"] for lp in layers], axis=0)     # (L, D, K)

    # --- fused embedding + all-layer Gaussian edge weights (one pallas_call) ---
    h, gw_flat = _prologue(feature_p, params["We"], params["be"], pseudo_t,
                           wp_all, bp_all, mu_all, is2_all,
                           L=L, K=K, n_pad=n_pad, cp=cp)
    gw_all = gw_flat.reshape(L, K, E)

    # scatter indices for the lane-concatenated weighted adjacency (dst, K*src)
    cols_b = jnp.broadcast_to(col[None, :], (K, E))
    rows_b = row[None, :] + (jnp.arange(K, dtype=row.dtype) * n_pad)[:, None]

    # --- GMM layers ---
    for li, lp in enumerate(layers):
        # TODO(synk): dense weighted adjacency is O(K*N^2); for large sparse graphs
        # replace with an in-kernel gather/scatter over (row, col) via scalar prefetch.
        a_cat = (jnp.zeros((n_pad, K * n_pad), jnp.float32)
                 .at[cols_b, rows_b].add(gw_all[li])
                 .astype(jnp.bfloat16))                               # one batched scatter, bf16 storage
        if batch_norm:
            scale = lp["gamma"] * jax.lax.rsqrt(lp["var"] + eps)
            shift = lp["beta"] - lp["mean"] * scale
        else:
            scale = jnp.ones((1, cp), jnp.float32)
            shift = jnp.zeros((1, cp), jnp.float32)
        c_in, c_out = lp["logical_dims"]
        h = _gmm_layer(h, a_cat, lp["Wfc"], lp["bias"], scale, shift,
                       K=K, cp=cp, n_pad=n_pad, tile_n=tile_n,
                       residual=bool(residual and (c_in == c_out)))

    # --- mean readout pooling matrix (padded nodes get zero weight) ---
    batch_p = jnp.pad(batch, (0, n_pad - N), constant_values=-1)
    onehot = (batch_p[None, :] == jnp.arange(num_graphs)[:, None]).astype(jnp.float32)
    counts = jnp.maximum(onehot.sum(axis=1, keepdims=True), 1.0)
    pool = onehot / counts                                            # (G, n_pad)

    out_p = _readout(pool, h, params["mlp"], cp=cp)                   # (G, 128)
    return out_p[:, :params["n_classes"]]


# ----------------------------------------------------------------------------
if __name__ == "__main__":
    in_dim, hidden_dim, out_dim = 4, 32, 32
    n_classes, K, pseudo_dim, n_layers = 4, 3, 2, 3
    N, E, G = 24, 64, 2

    key = jax.random.PRNGKey(0)
    kf, ke1, ke2 = jax.random.split(key, 3)
    feature = jax.random.normal(kf, (N, in_dim), jnp.float32)
    row = jax.random.randint(ke1, (E,), 0, N, dtype=jnp.int32)
    col = jax.random.randint(ke2, (E,), 0, N, dtype=jnp.int32)
    edge_index = jnp.stack([row, col], axis=0)                        # (2, E)
    batch = jnp.where(jnp.arange(N) < N // 2, 0, 1).astype(jnp.int32)  # (N,)

    params = init_params(jax.random.PRNGKey(42), in_dim, hidden_dim, out_dim,
                         n_classes, K, pseudo_dim, n_layers)

    out = monet_forward(params, feature, edge_index, batch, G)
    out = jax.block_until_ready(out)
    assert out.shape == (G, n_classes)
    assert bool(jnp.all(jnp.isfinite(out)))
    print("KERNEL_OK")
</pallas_src>

<mosaic_0001>
module attributes {stable_mosaic.version = 11 : i64} {
  func.func @_prologue_kernel(%arg0: memref<128x4xf32, #tpu.memory_space<vmem>>, %arg1: memref<4x128xf32, #tpu.memory_space<vmem>>, %arg2: memref<1x128xf32, #tpu.memory_space<vmem>>, %arg3: memref<2x64xf32, #tpu.memory_space<vmem>>, %arg4: memref<3x2x2xf32, #tpu.memory_space<vmem>>, %arg5: memref<3x2x1xf32, #tpu.memory_space<vmem>>, %arg6: memref<3x2x3xf32, #tpu.memory_space<vmem>>, %arg7: memref<3x2x3xf32, #tpu.memory_space<vmem>>, %arg8: memref<128x128xf32, #tpu.memory_space<vmem>>, %arg9: memref<9x64xf32, #tpu.memory_space<vmem>>) attributes {dimension_semantics = [], scalar_prefetch = 0 : i64, scratch_operands = 0 : i64, tpu.core_type = #tpu.core_type<tc>} {
    %c0 = arith.constant 0 : index
    %c0_0 = arith.constant 0 : index
    %0 = vector.load %arg0[%c0, %c0_0] : memref<128x4xf32, #tpu.memory_space<vmem>>, vector<128x4xf32>
    %c0_1 = arith.constant 0 : index
    %c0_2 = arith.constant 0 : index
    %1 = vector.load %arg1[%c0_1, %c0_2] : memref<4x128xf32, #tpu.memory_space<vmem>>, vector<4x128xf32>
    %cst = arith.constant dense<0.000000e+00> : vector<128x128xf32>
    %2 = tpu.matmul %0, %1, %cst {dimension_numbers = #tpu.dot_dimension_numbers<[1], [0], [0], [1], [0, 0, 1, 1], [], []>} : vector<128x4xf32>, vector<4x128xf32>, vector<128x128xf32> -> vector<128x128xf32>
    %c0_3 = arith.constant 0 : index
    %c0_4 = arith.constant 0 : index
    %3 = vector.load %arg2[%c0_3, %c0_4] : memref<1x128xf32, #tpu.memory_space<vmem>>, vector<1x128xf32>
    %4 = vector.broadcast %3 : vector<1x128xf32> to vector<128x128xf32>
    %5 = arith.addf %2, %4 : vector<128x128xf32>
    %c0_5 = arith.constant 0 : index
    %c0_6 = arith.constant 0 : index
    %6 = vector.load %arg8[%c0_5, %c0_6] : memref<128x128xf32, #tpu.memory_space<vmem>>, vector<128x128xf32>
    tpu.vector_store %arg8[%c0_5, %c0_6], %5 {strides = array<i32>} : memref<128x128xf32, #tpu.memory_space<vmem>>, vector<128x128xf32>,
    %c0_7 = arith.constant 0 : index
    %c0_8 = arith.constant 0 : index
    %7 = vector.load %arg3[%c0_7, %c0_8] : memref<2x64xf32, #tpu.memory_space<vmem>>, vector<2x64xf32>
    %c0_9 = arith.constant 0 : index
    %c0_10 = arith.constant 0 : index
    %c0_11 = arith.constant 0 : index
    %8 = vector.load %arg4[%c0_9, %c0_10, %c0_11] : memref<3x2x2xf32, #tpu.memory_space<vmem>>, vector<1x2x2xf32>
    %9 = vector.shape_cast %8 : vector<1x2x2xf32> to vector<2x2xf32>
    %10 = vector.extract_strided_slice %9 {offsets = [0, 0], sizes = [2, 1], strides = [1, 1]} : vector<2x2xf32> to vector<2x1xf32>
    %11 = vector.extract_strided_slice %7 {offsets = [0, 0], sizes = [1, 64], strides = [1, 1]} : vector<2x64xf32> to vector<1x64xf32>
    %12 = vector.broadcast %10 : vector<2x1xf32> to vector<2x64xf32>
    %13 = vector.broadcast %11 : vector<1x64xf32> to vector<2x64xf32>
    %14 = arith.mulf %12, %13 : vector<2x64xf32>
    %15 = vector.extract_strided_slice %9 {offsets = [0, 1], sizes = [2, 1], strides = [1, 1]} : vector<2x2xf32> to vector<2x1xf32>
    %16 = vector.extract_strided_slice %7 {offsets = [1, 0], sizes = [1, 64], strides = [1, 1]} : vector<2x64xf32> to vector<1x64xf32>
    %17 = vector.broadcast %15 : vector<2x1xf32> to vector<2x64xf32>
    %18 = vector.broadcast %16 : vector<1x64xf32> to vector<2x64xf32>
    %19 = arith.mulf %17, %18 : vector<2x64xf32>
    %20 = arith.addf %14, %19 : vector<2x64xf32>
    %c0_12 = arith.constant 0 : index
    %c0_13 = arith.constant 0 : index
    %c0_14 = arith.constant 0 : index
    %21 = vector.load %arg5[%c0_12, %c0_13, %c0_14] : memref<3x2x1xf32, #tpu.memory_space<vmem>>, vector<1x2x1xf32>
    %22 = vector.shape_cast %21 : vector<1x2x1xf32> to vector<2x1xf32>
    %23 = vector.broadcast %22 : vector<2x1xf32> to vector<2x64xf32>
    %24 = arith.addf %20, %23 : vector<2x64xf32>
    %25 = math.tanh %24 : vector<2x64xf32>
    %c0_15 = arith.constant 0 : index
    %c0_16 = arith.constant 0 : index
    %c0_17 = arith.constant 0 : index
    %26 = vector.load %arg6[%c0_15, %c0_16, %c0_17] : memref<3x2x3xf32, #tpu.memory_space<vmem>>, vector<1x2x3xf32>
    %27 = vector.shape_cast %26 : vector<1x2x3xf32> to vector<2x3xf32>
    %c0_18 = arith.constant 0 : index
    %c0_19 = arith.constant 0 : index
    %c0_20 = arith.constant 0 : index
    %28 = vector.load %arg7[%c0_18, %c0_19, %c0_20] : memref<3x2x3xf32, #tpu.memory_space<vmem>>, vector<1x2x3xf32>
    %29 = vector.shape_cast %28 : vector<1x2x3xf32> to vector<2x3xf32>
    %30 = vector.extract_strided_slice %27 {offsets = [0, 0], sizes = [2, 1], strides = [1, 1]} : vector<2x3xf32> to vector<2x1xf32>
    %31 = vector.broadcast %30 : vector<2x1xf32> to vector<2x64xf32>
    %32 = arith.subf %25, %31 : vector<2x64xf32>
    %33 = arith.mulf %32, %32 : vector<2x64xf32>
    %34 = vector.extract_strided_slice %29 {offsets = [0, 0], sizes = [2, 1], strides = [1, 1]} : vector<2x3xf32> to vector<2x1xf32>
    %35 = vector.broadcast %34 : vector<2x1xf32> to vector<2x64xf32>
    %36 = arith.mulf %33, %35 : vector<2x64xf32>
    %cst_21 = arith.constant dense<0.000000e+00> : vector<64xf32>
    %37 = vector.multi_reduction <add>, %36, %cst_21 [0] : vector<2x64xf32> to vector<64xf32>
    %38 = vector.shape_cast %37 : vector<64xf32> to vector<1x64xf32>
    %39 = vector.extract_strided_slice %27 {offsets = [0, 1], sizes = [2, 1], strides = [1, 1]} : vector<2x3xf32> to vector<2x1xf32>
    %40 = vector.broadcast %39 : vector<2x1xf32> to vector<2x64xf32>
    %41 = arith.subf %25, %40 : vector<2x64xf32>
    %42 = arith.mulf %41, %41 : vector<2x64xf32>
    %43 = vector.extract_strided_slice %29 {offsets = [0, 1], sizes = [2, 1], strides = [1, 1]} : vector<2x3xf32> to vector<2x1xf32>
    %44 = vector.broadcast %43 : vector<2x1xf32> to vector<2x64xf32>
    %45 = arith.mulf %42, %44 : vector<2x64xf32>
    %cst_22 = arith.constant dense<0.000000e+00> : vector<64xf32>
    %46 = vector.multi_reduction <add>, %45, %cst_22 [0] : vector<2x64xf32> to vector<64xf32>
    %47 = vector.shape_cast %46 : vector<64xf32> to vector<1x64xf32>
    %48 = vector.extract_strided_slice %27 {offsets = [0, 2], sizes = [2, 1], strides = [1, 1]} : vector<2x3xf32> to vector<2x1xf32>
    %49 = vector.broadcast %48 : vector<2x1xf32> to vector<2x64xf32>
    %50 = arith.subf %25, %49 : vector<2x64xf32>
    %51 = arith.mulf %50, %50 : vector<2x64xf32>
    %52 = vector.extract_strided_slice %29 {offsets = [0, 2], sizes = [2, 1], strides = [1, 1]} : vector<2x3xf32> to vector<2x1xf32>
    %53 = vector.broadcast %52 : vector<2x1xf32> to vector<2x64xf32>
    %54 = arith.mulf %51, %53 : vector<2x64xf32>
    %cst_23 = arith.constant dense<0.000000e+00> : vector<64xf32>
    %55 = vector.multi_reduction <add>, %54, %cst_23 [0] : vector<2x64xf32> to vector<64xf32>
    %56 = vector.shape_cast %55 : vector<64xf32> to vector<1x64xf32>
    %c1 = arith.constant 1 : index
    %c0_24 = arith.constant 0 : index
    %c0_25 = arith.constant 0 : index
    %57 = vector.load %arg4[%c1, %c0_24, %c0_25] : memref<3x2x2xf32, #tpu.memory_space<vmem>>, vector<1x2x2xf32>
    %58 = vector.shape_cast %57 : vector<1x2x2xf32> to vector<2x2xf32>
    %59 = vector.extract_strided_slice %58 {offsets = [0, 0], sizes = [2, 1], strides = [1, 1]} : vector<2x2xf32> to vector<2x1xf32>
    %60 = vector.extract_strided_slice %7 {offsets = [0, 0], sizes = [1, 64], strides = [1, 1]} : vector<2x64xf32> to vector<1x64xf32>
    %61 = vector.broadcast %59 : vector<2x1xf32> to vector<2x64xf32>
    %62 = vector.broadcast %60 : vector<1x64xf32> to vector<2x64xf32>
    %63 = arith.mulf %61, %62 : vector<2x64xf32>
    %64 = vector.extract_strided_slice %58 {offsets = [0, 1], sizes = [2, 1], strides = [1, 1]} : vector<2x2xf32> to vector<2x1xf32>
    %65 = vector.extract_strided_slice %7 {offsets = [1, 0], sizes = [1, 64], strides = [1, 1]} : vector<2x64xf32> to vector<1x64xf32>
    %66 = vector.broadcast %64 : vector<2x1xf32> to vector<2x64xf32>
    %67 = vector.broadcast %65 : vector<1x64xf32> to vector<2x64xf32>
    %68 = arith.mulf %66, %67 : vector<2x64xf32>
    %69 = arith.addf %63, %68 : vector<2x64xf32>
    %c1_26 = arith.constant 1 : index
    %c0_27 = arith.constant 0 : index
    %c0_28 = arith.constant 0 : index
    %70 = vector.load %arg5[%c1_26, %c0_27, %c0_28] : memref<3x2x1xf32, #tpu.memory_space<vmem>>, vector<1x2x1xf32>
    %71 = vector.shape_cast %70 : vector<1x2x1xf32> to vector<2x1xf32>
    %72 = vector.broadcast %71 : vector<2x1xf32> to vector<2x64xf32>
    %73 = arith.addf %69, %72 : vector<2x64xf32>
    %74 = math.tanh %73 : vector<2x64xf32>
    %c1_29 = arith.constant 1 : index
    %c0_30 = arith.constant 0 : index
    %c0_31 = arith.constant 0 : index
    %75 = vector.load %arg6[%c1_29, %c0_30, %c0_31] : memref<3x2x3xf32, #tpu.memory_space<vmem>>, vector<1x2x3xf32>
    %76 = vector.shape_cast %75 : vector<1x2x3xf32> to vector<2x3xf32>
    %c1_32 = arith.constant 1 : index
    %c0_33 = arith.constant 0 : index
    %c0_34 = arith.constant 0 : index
    %77 = vector.load %arg7[%c1_32, %c0_33, %c0_34] : memref<3x2x3xf32, #tpu.memory_space<vmem>>, vector<1x2x3xf32>
    %78 = vector.shape_cast %77 : vector<1x2x3xf32> to vector<2x3xf32>
    %79 = vector.extract_strided_slice %76 {offsets = [0, 0], sizes = [2, 1], strides = [1, 1]} : vector<2x3xf32> to vector<2x1xf32>
    %80 = vector.broadcast %79 : vector<2x1xf32> to vector<2x64xf32>
    %81 = arith.subf %74, %80 : vector<2x64xf32>
    %82 = arith.mulf %81, %81 : vector<2x64xf32>
    %83 = vector.extract_strided_slice %78 {offsets = [0, 0], sizes = [2, 1], strides = [1, 1]} : vector<2x3xf32> to vector<2x1xf32>
    %84 = vector.broadcast %83 : vector<2x1xf32> to vector<2x64xf32>
    %85 = arith.mulf %82, %84 : vector<2x64xf32>
    %cst_35 = arith.constant dense<0.000000e+00> : vector<64xf32>
    %86 = vector.multi_reduction <add>, %85, %cst_35 [0] : vector<2x64xf32> to vector<64xf32>
    %87 = vector.shape_cast %86 : vector<64xf32> to vector<1x64xf32>
    %88 = vector.extract_strided_slice %76 {offsets = [0, 1], sizes = [2, 1], strides = [1, 1]} : vector<2x3xf32> to vector<2x1xf32>
    %89 = vector.broadcast %88 : vector<2x1xf32> to vector<2x64xf32>
    %90 = arith.subf %74, %89 : vector<2x64xf32>
    %91 = arith.mulf %90, %90 : vector<2x64xf32>
    %92 = vector.extract_strided_slice %78 {offsets = [0, 1], sizes = [2, 1], strides = [1, 1]} : vector<2x3xf32> to vector<2x1xf32>
    %93 = vector.broadcast %92 : vector<2x1xf32> to vector<2x64xf32>
    %94 = arith.mulf %91, %93 : vector<2x64xf32>
    %cst_36 = arith.constant dense<0.000000e+00> : vector<64xf32>
    %95 = vector.multi_reduction <add>, %94, %cst_36 [0] : vector<2x64xf32> to vector<64xf32>
    %96 = vector.shape_cast %95 : vector<64xf32> to vector<1x64xf32>
    %97 = vector.extract_strided_slice %76 {offsets = [0, 2], sizes = [2, 1], strides = [1, 1]} : vector<2x3xf32> to vector<2x1xf32>
    %98 = vector.broadcast %97 : vector<2x1xf32> to vector<2x64xf32>
    %99 = arith.subf %74, %98 : vector<2x64xf32>
    %100 = arith.mulf %99, %99 : vector<2x64xf32>
    %101 = vector.extract_strided_slice %78 {offsets = [0, 2], sizes = [2, 1], strides = [1, 1]} : vector<2x3xf32> to vector<2x1xf32>
    %102 = vector.broadcast %101 : vector<2x1xf32> to vector<2x64xf32>
    %103 = arith.mulf %100, %102 : vector<2x64xf32>
    %cst_37 = arith.constant dense<0.000000e+00> : vector<64xf32>
    %104 = vector.multi_reduction <add>, %103, %cst_37 [0] : vector<2x64xf32> to vector<64xf32>
    %105 = vector.shape_cast %104 : vector<64xf32> to vector<1x64xf32>
    %c2 = arith.constant 2 : index
    %c0_38 = arith.constant 0 : index
    %c0_39 = arith.constant 0 : index
    %106 = vector.load %arg4[%c2, %c0_38, %c0_39] : memref<3x2x2xf32, #tpu.memory_space<vmem>>, vector<1x2x2xf32>
    %107 = vector.shape_cast %106 : vector<1x2x2xf32> to vector<2x2xf32>
    %108 = vector.extract_strided_slice %107 {offsets = [0, 0], sizes = [2, 1], strides = [1, 1]} : vector<2x2xf32> to vector<2x1xf32>
    %109 = vector.extract_strided_slice %7 {offsets = [0, 0], sizes = [1, 64], strides = [1, 1]} : vector<2x64xf32> to vector<1x64xf32>
    %110 = vector.broadcast %108 : vector<2x1xf32> to vector<2x64xf32>
    %111 = vector.broadcast %109 : vector<1x64xf32> to vector<2x64xf32>
    %112 = arith.mulf %110, %111 : vector<2x64xf32>
    %113 = vector.extract_strided_slice %107 {offsets = [0, 1], sizes = [2, 1], strides = [1, 1]} : vector<2x2xf32> to vector<2x1xf32>
    %114 = vector.extract_strided_slice %7 {offsets = [1, 0], sizes = [1, 64], strides = [1, 1]} : vector<2x64xf32> to vector<1x64xf32>
    %115 = vector.broadcast %113 : vector<2x1xf32> to vector<2x64xf32>
    %116 = vector.broadcast %114 : vector<1x64xf32> to vector<2x64xf32>
    %117 = arith.mulf %115, %116 : vector<2x64xf32>
    %118 = arith.addf %112, %117 : vector<2x64xf32>
    %c2_40 = arith.constant 2 : index
    %c0_41 = arith.constant 0 : index
    %c0_42 = arith.constant 0 : index
    %119 = vector.load %arg5[%c2_40, %c0_41, %c0_42] : memref<3x2x1xf32, #tpu.memory_space<vmem>>, vector<1x2x1xf32>
    %120 = vector.shape_cast %119 : vector<1x2x1xf32> to vector<2x1xf32>
    %121 = vector.broadcast %120 : vector<2x1xf32> to vector<2x64xf32>
    %122 = arith.addf %118, %121 : vector<2x64xf32>
    %123 = math.tanh %122 : vector<2x64xf32>
    %c2_43 = arith.constant 2 : index
    %c0_44 = arith.constant 0 : index
    %c0_45 = arith.constant 0 : index
    %124 = vector.load %arg6[%c2_43, %c0_44, %c0_45] : memref<3x2x3xf32, #tpu.memory_space<vmem>>, vector<1x2x3xf32>
    %125 = vector.shape_cast %124 : vector<1x2x3xf32> to vector<2x3xf32>
    %c2_46 = arith.constant 2 : index
    %c0_47 = arith.constant 0 : index
    %c0_48 = arith.constant 0 : index
    %126 = vector.load %arg7[%c2_46, %c0_47, %c0_48] : memref<3x2x3xf32, #tpu.memory_space<vmem>>, vector<1x2x3xf32>
    %127 = vector.shape_cast %126 : vector<1x2x3xf32> to vector<2x3xf32>
    %128 = vector.extract_strided_slice %125 {offsets = [0, 0], sizes = [2, 1], strides = [1, 1]} : vector<2x3xf32> to vector<2x1xf32>
    %129 = vector.broadcast %128 : vector<2x1xf32> to vector<2x64xf32>
    %130 = arith.subf %123, %129 : vector<2x64xf32>
    %131 = arith.mulf %130, %130 : vector<2x64xf32>
    %132 = vector.extract_strided_slice %127 {offsets = [0, 0], sizes = [2, 1], strides = [1, 1]} : vector<2x3xf32> to vector<2x1xf32>
    %133 = vector.broadcast %132 : vector<2x1xf32> to vector<2x64xf32>
    %134 = arith.mulf %131, %133 : vector<2x64xf32>
    %cst_49 = arith.constant dense<0.000000e+00> : vector<64xf32>
    %135 = vector.multi_reduction <add>, %134, %cst_49 [0] : vector<2x64xf32> to vector<64xf32>
    %136 = vector.shape_cast %135 : vector<64xf32> to vector<1x64xf32>
    %137 = vector.extract_strided_slice %125 {offsets = [0, 1], sizes = [2, 1], strides = [1, 1]} : vector<2x3xf32> to vector<2x1xf32>
    %138 = vector.broadcast %137 : vector<2x1xf32> to vector<2x64xf32>
    %139 = arith.subf %123, %138 : vector<2x64xf32>
    %140 = arith.mulf %139, %139 : vector<2x64xf32>
    %141 = vector.extract_strided_slice %127 {offsets = [0, 1], sizes = [2, 1], strides = [1, 1]} : vector<2x3xf32> to vector<2x1xf32>
    %142 = vector.broadcast %141 : vector<2x1xf32> to vector<2x64xf32>
    %143 = arith.mulf %140, %142 : vector<2x64xf32>
    %cst_50 = arith.constant dense<0.000000e+00> : vector<64xf32>
    %144 = vector.multi_reduction <add>, %143, %cst_50 [0] : vector<2x64xf32> to vector<64xf32>
    %145 = vector.shape_cast %144 : vector<64xf32> to vector<1x64xf32>
    %146 = vector.extract_strided_slice %125 {offsets = [0, 2], sizes = [2, 1], strides = [1, 1]} : vector<2x3xf32> to vector<2x1xf32>
    %147 = vector.broadcast %146 : vector<2x1xf32> to vector<2x64xf32>
    %148 = arith.subf %123, %147 : vector<2x64xf32>
    %149 = arith.mulf %148, %148 : vector<2x64xf32>
    %150 = vector.extract_strided_slice %127 {offsets = [0, 2], sizes = [2, 1], strides = [1, 1]} : vector<2x3xf32> to vector<2x1xf32>
    %151 = vector.broadcast %150 : vector<2x1xf32> to vector<2x64xf32>
    %152 = arith.mulf %149, %151 : vector<2x64xf32>
    %cst_51 = arith.constant dense<0.000000e+00> : vector<64xf32>
    %153 = vector.multi_reduction <add>, %152, %cst_51 [0] : vector<2x64xf32> to vector<64xf32>
    %154 = vector.shape_cast %153 : vector<64xf32> to vector<1x64xf32>
    %155 = tpu.concatenate %38, %47, %56, %87, %96, %105, %136, %145, %154 in 0 : vector<1x64xf32>, vector<1x64xf32>, vector<1x64xf32>, vector<1x64xf32>, vector<1x64xf32>, vector<1x64xf32>, vector<1x64xf32>, vector<1x64xf32>, vector<1x64xf32> -> vector<9x64xf32>
    %cst_52 = arith.constant -5.000000e-01 : f32
    %156 = vector.broadcast %cst_52 : f32 to vector<9x64xf32>
    %157 = arith.mulf %156, %155 : vector<9x64xf32>
    %158 = math.exp %157 : vector<9x64xf32>
    %c0_53 = arith.constant 0 : index
    %c0_54 = arith.constant 0 : index
    %159 = vector.load %arg9[%c0_53, %c0_54] : memref<9x64xf32, #tpu.memory_space<vmem>>, vector<9x64xf32>
    tpu.vector_store %arg9[%c0_53, %c0_54], %158 {strides = array<i32>} : memref<9x64xf32, #tpu.memory_space<vmem>>, vector<9x64xf32>,
    return
  }
}

</mosaic_0001>

<bundles_post_ra>
// kernel: tpu_custom_call.1
= control target key start
LH: loop header
LB: loop body
LE: loop exit
PB: predicated region body
PF: predicated region fallthrough
CT: control target
= control target key end

     0   :  { %15 = vsyncpa [#allocation3], 0  ;;  %vm106_vm0 = vcmask 1043456   ;;  %v733_v2 = vmov 0   ;;  %vm57_vm1 = vcmask 31744   ;;  %v734_v11 = vmov 1   ;;  %s956_s0 = inlined_call_operand.vmem [shape: f32[128,4], index: 0, kind: input, shape index: {}]   ;;  %s957_s1 = inlined_call_operand.vmem [shape: f32[4,128], index: 1, kind: input, shape index: {}]   ;;  %s958_s2 = inlined_call_operand.vmem [shape: f32[1,128], index: 2, kind: input, shape index: {}]   ;;  %s959_s3 = inlined_call_operand.vmem [shape: f32[2,64], index: 3, kind: input, shape index: {}]   ;;  %s960_s4 = inlined_call_operand.vmem [shape: f32[3,2,2], index: 4, kind: input, shape index: {}]   ;;  %s961_s5 = inlined_call_operand.vmem [shape: f32[3,2,1], index: 5, kind: input, shape index: {}]   ;;  %s962_s6 = inlined_call_operand.vmem [shape: f32[3,2,3], index: 6, kind: input, shape index: {}]   ;;  %s963_s7 = inlined_call_operand.vmem [shape: f32[3,2,3], index: 7, kind: input, shape index: {}]   ;;  %s964_s8 = inlined_call_operand.hbm [shape: f32[128,128], index: 8, kind: output, shape index: {0}]   ;;  %s965_s9 = inlined_call_operand.hbm [shape: f32[9,64], index: 9, kind: output, shape index: {1}]  }
   0x1   :  { %v599_v0 = vld [vmem:[%s960_s4 + $0x2] sm:$0x3]  ;;  %v272_v1 = vld [vmem:[%s960_s4] sm:$0x3]  ;;  %660 = vset.pattern.permute.xlu1 %v733_v2  ;;  %659 = vset.pattern.permute.xlu0 %v733_v2  ;;  %v34_v6 = vld [vmem:[%s956_s0 + $0x8] sm:$0xff] }
   0x2   :  { %v49_v3 = vld [vmem:[%s957_s1] sm:$0xf]  ;;  %364 = vperm.xlu1 %660, %v599_v0   ;;  %275 = vperm.xlu0 %659, %v272_v1   ;;  %v42_v7 = vld [vmem:[%s956_s0 + $0x48] sm:$0xff]  ;;  %v603_v8 = vld [vmem:[%s960_s4 + $0x4] sm:$0x3] }
   0x3   :  { %v33_v4 = vld [vmem:[%s956_s0] sm:$0xff]  ;;  %624 = vmatprep.subr.msk.mxu0 %vm106_vm0, %v49_v3  ;;  %650 = vmatprep.subr.msk.mxu1 %vm106_vm0, %v49_v3  ;;  %v35_v9 = vld [vmem:[%s956_s0 + $0x10] sm:$0xff]  ;;  %v36_v12 = vld [vmem:[%s956_s0 + $0x18] sm:$0xff] }
   0x4   :  { %v41_v5 = vld [vmem:[%s956_s0 + $0x40] sm:$0xff]  ;;  %625 = vmatpush3.msk.msra.mxu0 %vm106_vm0, %v49_v3  ;;  %651 = vmatpush3.msk.msra.mxu1 %vm106_vm0, %v49_v3  ;;  %v43_v10 = vld [vmem:[%s956_s0 + $0x50] sm:$0xff]  ;;  %v44_v13 = vld [vmem:[%s956_s0 + $0x58] sm:$0xff] }
   0x5   :  { %626 = vmatprep.mubr.msk.f32.mxu0 %vm57_vm1, %v33_v4  ;;  %638 = vmatprep.mubr.msk.f32.mxu1 %vm57_vm1, %v41_v5  ;;  %v604_v14 = vld [vmem:[%s961_s5 + $0x4] sm:$0x3]  ;;  %v293_v17 = vld [vmem:[%s961_s5] sm:$0x3] }
   0x6   :  { %627 = vmatmul.mubr.msk.f32.vlgmr.msra.gmra.mrb[0].mxu0 %vm57_vm1, %v34_v6  ;;  %639 = vmatmul.mubr.msk.f32.vlgmr.msra.gmra.mrb[0].mxu1 %vm57_vm1, %v42_v7  ;;  %v37_v15 = vld [vmem:[%s956_s0 + $0x20] sm:$0xff] }
   0x7   :  { %661 = vset.pattern.permute.xlu1 %v734_v11  ;;  %447 = vperm.xlu0 %659, %v603_v8   ;;  %v45_v16 = vld [vmem:[%s956_s0 + $0x60] sm:$0xff] }
   0x8   :  { %369 = vperm.xlu1 %661, %v599_v0   ;;  %629 = vmatprep.mubr.msk.f32.mxu0 %vm57_vm1, %v35_v9 }
   0x9   :  { %641 = vmatprep.mubr.msk.f32.mxu1 %vm57_vm1, %v43_v10 }
   0xa   :  { %630 = vmatmul.mubr.msk.f32.gmra.mrb[2].mxu0 %vm57_vm1, %v36_v12  ;;  %642 = vmatmul.mubr.msk.f32.gmra.mrb[2].mxu1 %vm57_vm1, %v44_v13 }
   0xb   :  { %16 = vsyncpa [#allocation5], 0  ;;  %461 = vperm.xlu0 %659, %v604_v14   ;;  %632 = vmatprep.mubr.msk.f32.mxu0 %vm57_vm1, %v37_v15  ;;  %v38_v18 = vld [vmem:[%s956_s0 + $0x28] sm:$0xff]  ;;  %v39_v20 = vld [vmem:[%s956_s0 + $0x30] sm:$0xff]  ;;  %v735_v29 = vmov 2   ;;  %v278_v34 = vlaneseq  ;;  %vm316_vm2 = vcmask 517120  }
   0xc   :  { %v46_v19 = vld [vmem:[%s956_s0 + $0x68] sm:$0xff]  ;;  %662 = vset.pattern.permute.xlu1 %v733_v2  ;;  %644 = vmatprep.mubr.msk.f32.mxu1 %vm57_vm1, %v45_v16  ;;  %v47_v21 = vld [vmem:[%s956_s0 + $0x70] sm:$0xff]  ;;  %v40_v22 = vld [vmem:[%s956_s0 + $0x38] sm:$0xff]  ;;  %vm526_vm3 = vcmask 1040384   ;;  %vm528_vm4 = vcmask 1041408   ;;  %vm530_vm5 = vcmask 1042432  }
   0xd   :  { %296 = vperm.xlu1 %662, %v293_v17   ;;  %v48_v23 = vld [vmem:[%s956_s0 + $0x78] sm:$0xff]  ;;  %v301_v24 = vld [vmem:[%s962_s6] sm:$0x3]  ;;  %v600_v25 = vld [vmem:[%s961_s5 + $0x2] sm:$0x3]  ;;  %v279_v37 = vshrl.u32 %v278_v34, 7 }
   0xe   :  { %633 = vmatmul.mubr.msk.f32.gmra.mrb[4].mxu0 %vm57_vm1, %v38_v18  ;;  %645 = vmatmul.mubr.msk.f32.gmra.mrb[4].mxu1 %vm57_vm1, %v46_v19  ;;  %v601_v26 = vld [vmem:[%s962_s6 + $0x2] sm:$0x3]  ;;  %v302_v27 = vld [vmem:[%s963_s7] sm:$0x3]  ;;  %v605_v28 = vld [vmem:[%s962_s6 + $0x4] sm:$0x3] }
   0xf   :  { %665 = vset.pattern.permute.xlu0 %v734_v11  ;;  %635 = vmatprep.mubr.msk.f32.mxu0 %vm57_vm1, %v39_v20  ;;  %v602_v30 = vld [vmem:[%s963_s7 + $0x2] sm:$0x3]  ;;  %v606_v31 = vld [vmem:[%s963_s7 + $0x4] sm:$0x3]  ;;  %v280_v39 = vsub.s32 0, %v279_v37  ;;  %v289_v40 = vsub.s32 1, %v279_v37 }
  0x10   :  { %284 = vperm.xlu0 %665, %v272_v1   ;;  %647 = vmatprep.mubr.msk.f32.mxu1 %vm57_vm1, %v47_v21  ;;  %v271_v42 = vld [vmem:[%s959_s3] sm:$0x3]  ;;  %vm533_vm6 = vcmask 1044480   ;;  %vm535_vm7 = vcmask 1045504   ;;  %vm537_vm8 = vcmask 1046528   ;;  %vm547_vm9 = vcmask 516096  }
  0x11   :  { %663 = vset.pattern.permute.xlu1 %v734_v11  ;;  %v281_v44 = vrot.slane %v271_v42, %v280_v39  ;;  %v290_v45 = vrot.slane %v271_v42, %v289_v40  ;;  %s737_s1 = smov [#allocation4]   ;;  %vm545_vm10 = vcmask 523264  }
  0x12   :  { %452 = vperm.xlu1 %663, %v603_v8   ;;  %636 = vmatmul.mubr.msk.f32.gmra.mrb[6].mxu0 %vm57_vm1, %v40_v22  ;;  %s566_s21 = sshll.u32 %s737_s1, 4  ;;  %s925_s21 = int_to_ptr.vmem [resolvable:$true] %s566_s21 }
  0x13   :  { %648 = vmatmul.mubr.msk.f32.gmra.mrb[6].mxu1 %vm57_vm1, %v48_v23 }
  0x14   :  { %325 = vperm.xlu0 %665, %v301_v24  }
  0x16   :  { %664 = vset.pattern.permute.xlu1 %v733_v2 }
  0x17   :  { %378 = vperm.xlu1 %664, %v600_v25  }
  0x18   :  { %408 = vperm.xlu0 %665, %v601_v26  }
  0x1b   :  { %305 = vperm.xlu1 %664, %v301_v24  }
  0x1c   :  { %331 = vperm.xlu0 %665, %v302_v27  }
  0x1f   :  { %666 = vset.pattern.permute.xlu1 %v735_v29 }
  0x20   :  { %343 = vperm.xlu1 %666, %v301_v24   ;;  %491 = vperm.xlu0 %665, %v605_v28  }
  0x24   :  { %667 = vset.pattern.permute.xlu1 %v733_v2  ;;  %670 = vset.pattern.permute.xlu0 %v735_v29 }
  0x25   :  { %389 = vperm.xlu1 %667, %v601_v26   ;;  %349 = vperm.xlu0 %670, %v302_v27  }
  0x29   :  { %312 = vperm.xlu1 %667, %v302_v27   ;;  %432 = vperm.xlu0 %670, %v602_v30  }
  0x2d   :  { %668 = vset.pattern.permute.xlu1 %v735_v29  ;;  %515 = vperm.xlu0 %670, %v606_v31  }
  0x2e   :  { %426 = vperm.xlu1 %668, %v601_v26  }
  0x32   :  { %669 = vset.pattern.permute.xlu1 %v733_v2 }
  0x33   :  { %472 = vperm.xlu1 %669, %v605_v28  }
  0x37   :  { %396 = vperm.xlu1 %669, %v602_v30  }
  0x3b   :  { %671 = vset.pattern.permute.xlu1 %v734_v11 }
  0x3c   :  { %414 = vperm.xlu1 %671, %v602_v30  }
  0x40   :  { %672 = vset.pattern.permute.xlu1 %v735_v29 }
  0x41   :  { %509 = vperm.xlu1 %672, %v605_v28  }
  0x45   :  { %673 = vset.pattern.permute.xlu1 %v733_v2 }
  0x46   :  { %479 = vperm.xlu1 %673, %v606_v31  }
  0x4a   :  { %674 = vset.pattern.permute.xlu1 %v734_v11 }
  0x4b   :  { %497 = vperm.xlu1 %674, %v606_v31  }
  0x81   :  { %v365_v32 = vpop.permute.xlu1 %364  ;;  %v276_v33 = vpop.permute.xlu0 %275 }
  0x82   :  { %v282_v47 = vmul.f32 %v281_v44, %v276_v33  ;;  %v367_v55 = vmul.f32 %v365_v32, %v281_v44 }
  0x86   :  { %v448_v35 = vpop.permute.xlu0 %447 }
  0x87   :  { %v370_v36 = vpop.permute.xlu1 %369  ;;  %v450_v0 = vmul.f32 %v448_v35, %v281_v44 }
  0x88   :  { %v372_v51 = vmul.f32 %v370_v36, %v290_v45 }
  0x8a   :  { %v462_v38 = vpop.permute.xlu0 %461  ;;  %v373_v56 = vadd.f32 %v372_v51, %v367_v55 }
  0x8c   :  { %v297_v41 = vpop.permute.xlu1 %296 }
  0x8f   :  { %v285_v43 = vpop.permute.xlu0 %284 }
  0x90   :  { %v291_v48 = vmul.f32 %v290_v45, %v285_v43 }
  0x91   :  { %v453_v46 = vpop.permute.xlu1 %452 }
  0x92   :  { %v292_v49 = vadd.f32 %v291_v48, %v282_v47  ;;  %v455_v1 = vmul.f32 %v453_v46, %v290_v45 }
  0x93   :  { %v326_v54 = vpop.permute.xlu0 %325 }
  0x94   :  { %v299_v52 = vadd.f32 %v297_v41, %v292_v49  ;;  %v456_v4 = vadd.f32 %v455_v1, %v450_v0 }
  0x96   :  { %v379_v50 = vpop.permute.xlu1 %378  ;;  %675 = vtanh.f32 %v299_v52  ;;  %v464_v11 = vadd.f32 %v462_v38, %v456_v4 }
  0x97   :  { %v381_v58 = vadd.f32 %v379_v50, %v373_v56  ;;  %v409_v59 = vpop.permute.xlu0 %408 }
  0x99   :  { %677 = vtanh.f32 %v381_v58 }
  0x9a   :  { %v306_v53 = vpop.permute.xlu1 %305  ;;  %679 = vtanh.f32 %v464_v11 }
  0x9b   :  { %v332_v61 = vpop.permute.xlu0 %331 }
  0x9f   :  { %v344_v57 = vpop.permute.xlu1 %343  ;;  %v492_v5 = vpop.permute.xlu0 %491 }
  0xa0   :  { %v676_v62 = vpop.eup %675 }
  0xa1   :  { %v328_v2 = vsub.f32 %v676_v62, %v326_v54  ;;  %v308_v3 = vsub.f32 %v676_v62, %v306_v53  ;;  %v346_v8 = vsub.f32 %v676_v62, %v344_v57 }
  0xa3   :  { %v678_v7 = vpop.eup %677  ;;  %v329_v9 = vmul.f32 %v328_v2, %v328_v2  ;;  %v309_v10 = vmul.f32 %v308_v3, %v308_v3  ;;  %v347_v14 = vmul.f32 %v346_v8, %v346_v8 }
  0xa4   :  { %v390_v60 = vpop.permute.xlu1 %389  ;;  %v350_v17 = vpop.permute.xlu0 %349  ;;  %v411_v21 = vsub.f32 %v678_v7, %v409_v59 }
  0xa5   :  { %v392_v12 = vsub.f32 %v678_v7, %v390_v60  ;;  %v334_v16 = vmul.f32 %v332_v61, %v329_v9  ;;  %v352_v22 = vmul.f32 %v350_v17, %v347_v14  ;;  %v680_v41 = vpop.eup %679 }
  0xa6   :  { %v412_v30 = vmul.f32 %v411_v21, %v411_v21  ;;  %v494_v58 = vsub.f32 %v680_v41, %v492_v5 }
  0xa7   :  { %v393_v19 = vmul.f32 %v392_v12, %v392_v12  ;;  %v335_v24 = vsel %vm316_vm2, %v334_v16, 0.0  ;;  %v353_v32 = vsel %vm316_vm2, %v352_v22, 0.0 }
  0xa8   :  { %v313_v63 = vpop.permute.xlu1 %312  ;;  %v433_v28 = vpop.permute.xlu0 %432  ;;  %v336_v31 = vrot.slane %v335_v24, 4  ;;  %v354_v38 = vrot.slane %v353_v32, 4  ;;  %v495_v8 = vmul.f32 %v494_v58, %v494_v58 }
  0xa9   :  { %v315_v13 = vmul.f32 %v313_v63, %v309_v10 }
  0xaa   :  { %v337_v39 = vadd.f32 %v336_v31, %v335_v24  ;;  %v355_v48 = vadd.f32 %v354_v38, %v353_v32 }
  0xab   :  { %v317_v20 = vsel %vm316_vm2, %v315_v13, 0.0 }
  0xac   :  { %v318_v27 = vrot.slane %v317_v20, 4  ;;  %v338_v51 = vrot.slane %v337_v39, 2  ;;  %v516_v53 = vpop.permute.xlu0 %515  ;;  %v356_v59 = vrot.slane %v355_v48, 2 }
  0xad   :  { %v427_v6 = vpop.permute.xlu1 %426 }
  0xae   :  { %v429_v18 = vsub.f32 %v678_v7, %v427_v6  ;;  %v319_v35 = vadd.f32 %v318_v27, %v317_v20  ;;  %v339_v63 = vadd.f32 %v338_v51, %v337_v39  ;;  %v357_v9 = vadd.f32 %v356_v59, %v355_v48  ;;  %v581_v48 = vld [vmem:[%s958_s2] ss:$0 sm:$0xff]  ;;  %s736_s2 = smov [#allocation2]  }
  0xaf   :  { %s554_s20 = sshll.u32 %s736_s2, 4  ;;  %s555_s20 = int_to_ptr.vmem [resolvable:$true] %s554_s20 }
  0xb0   :  { %v430_v25 = vmul.f32 %v429_v18, %v429_v18  ;;  %v320_v44 = vrot.slane %v319_v35, 2  ;;  %v340_v12 = vrot.slane %v339_v63, 1  ;;  %v358_v20 = vrot.slane %v357_v9, 1  ;;  %s685_s22 = scalar_lea.vmem %s555_s20, 2048  ;;  %p690_p1 = scmp.lt.s32.totalorder %s555_s20, %s555_s20 }
  0xb1   :  { %p686_p0 = scmp.ne.s32.totalorder %s555_s20, %s685_s22  ;;  %p691_p2 = scmp.lt.s32.totalorder %s685_s22, %s685_s22 }
  0xb2   :  { %v473_v15 = vpop.permute.xlu1 %472  ;;  %v435_v33 = vmul.f32 %v433_v28, %v430_v25  ;;  %v321_v55 = vadd.f32 %v320_v44, %v319_v35  ;;  %v341_v24 = vadd.f32 %v340_v12, %v339_v63 }
  0xb3   :  { %v475_v45 = vsub.f32 %v680_v41, %v473_v15  ;;  %p692_p3 = por %p691_p2, %p690_p1 }
  0xb4   :  { %v436_v42 = vsel %vm316_vm2, %v435_v33, 0.0  ;;  %v322_v3 = vrot.slane %v321_v55, 1  ;;  %v359_v33 = vadd.f32 %v358_v20, %v357_v9 }
  0xb5   :  { %v437_v52 = vrot.slane %v436_v42, 4  ;;  %v476_v56 = vmul.f32 %v475_v45, %v475_v45  ;;  %p693_p4 = pnand %p692_p3, %p686_p0 }
  0xb6   :  { %v397_v23 = vpop.permute.xlu1 %396  ;;  %v323_v17 = vadd.f32 %v322_v3, %v321_v55 }
  0xb7   :  { %v399_v26 = vmul.f32 %v397_v23, %v393_v19  ;;  %v438_v0 = vadd.f32 %v437_v52, %v436_v42 }
  0xb9   :  { %v400_v29 = vsel %vm316_vm2, %v399_v26, 0.0  ;;  %v439_v5 = vrot.slane %v438_v0, 2 }
  0xba   :  { %v401_v36 = vrot.slane %v400_v29, 4 }
  0xbb   :  { %v415_v34 = vpop.permute.xlu1 %414  ;;  %v440_v25 = vadd.f32 %v439_v5, %v438_v0 }
  0xbc   :  { %v417_v37 = vmul.f32 %v415_v34, %v412_v30  ;;  %v402_v46 = vadd.f32 %v401_v36, %v400_v29  ;;  %v527_v29 = vsel %vm526_vm3, %v323_v17, %v341_v24 }
  0xbd   :  { %v441_v36 = vrot.slane %v440_v25, 1  ;;  %v529_v39 = vsel %vm528_vm4, %v527_v29, %v359_v33 }
  0xbe   :  { %v418_v40 = vsel %vm316_vm2, %v417_v37, 0.0  ;;  %v403_v57 = vrot.slane %v402_v46, 2 }
  0xbf   :  { %v419_v43 = vrot.slane %v418_v40, 4  ;;  %v442_v45 = vadd.f32 %v441_v36, %v440_v25 }
  0xc0   :  { %v510_v47 = vpop.permute.xlu1 %509  ;;  %v404_v4 = vadd.f32 %v403_v57, %v402_v46 }
  0xc1   :  { %v420_v49 = vadd.f32 %v419_v43, %v418_v40  ;;  %v512_v50 = vsub.f32 %v680_v41, %v510_v47 }
  0xc2   :  { %v405_v18 = vrot.slane %v404_v4, 1 }
  0xc3   :  { %v513_v54 = vmul.f32 %v512_v50, %v512_v50  ;;  %v421_v60 = vrot.slane %v420_v49, 2 }
  0xc4   :  { %v406_v30 = vadd.f32 %v405_v18, %v404_v4 }
  0xc5   :  { %v518_v61 = vmul.f32 %v516_v53, %v513_v54  ;;  %v480_v62 = vpop.permute.xlu1 %479  ;;  %v422_v10 = vadd.f32 %v421_v60, %v420_v49 }
  0xc6   :  { %v482_v1 = vmul.f32 %v480_v62, %v476_v56  ;;  %v531_v40 = vsel %vm530_vm5, %v529_v39, %v406_v30 }
  0xc7   :  { %v519_v2 = vsel %vm316_vm2, %v518_v61, 0.0  ;;  %v423_v21 = vrot.slane %v422_v10, 1 }
  0xc8   :  { %v520_v6 = vrot.slane %v519_v2, 4  ;;  %v483_v7 = vsel %vm316_vm2, %v482_v1, 0.0 }
  0xc9   :  { %v484_v11 = vrot.slane %v483_v7, 4  ;;  %v424_v34 = vadd.f32 %v423_v21, %v422_v10 }
  0xca   :  { %v521_v13 = vadd.f32 %v520_v6, %v519_v2  ;;  %v498_v14 = vpop.permute.xlu1 %497 }
  0xcb   :  { %v485_v15 = vadd.f32 %v484_v11, %v483_v7  ;;  %v500_v16 = vmul.f32 %v498_v14, %v495_v8  ;;  %v532_v43 = vsel %vm106_vm0, %v531_v40, %v424_v34 }
  0xcc   :  { %v522_v19 = vrot.slane %v521_v13, 2  ;;  %v534_v49 = vsel %vm533_vm6, %v532_v43, %v442_v45 }
  0xcd   :  { %v486_v22 = vrot.slane %v485_v15, 2  ;;  %v501_v23 = vsel %vm316_vm2, %v500_v16, 0.0 }
  0xce   :  { %v523_v26 = vadd.f32 %v522_v19, %v521_v13  ;;  %v502_v27 = vrot.slane %v501_v23, 4 }
  0xcf   :  { %v487_v28 = vadd.f32 %v486_v22, %v485_v15 }
  0xd0   :  { %v524_v31 = vrot.slane %v523_v26, 1  ;;  %v503_v32 = vadd.f32 %v502_v27, %v501_v23 }
  0xd1   :  { %v488_v35 = vrot.slane %v487_v28, 1 }
  0xd2   :  { %v525_v37 = vadd.f32 %v524_v31, %v523_v26  ;;  %v504_v38 = vrot.slane %v503_v32, 2 }
  0xd3   :  { %v489_v44 = vadd.f32 %v488_v35, %v487_v28 }
  0xd4   :  { %v540_v41 = vmul.f32 -0.5, %v525_v37  ;;  %v505_v42 = vadd.f32 %v504_v38, %v503_v32 }
  0xd5   :  { %v536_v51 = vsel %vm535_vm7, %v534_v49, %v489_v44 }
  0xd6   :  { %v543_v46 = vmul.f32 1.442695, %v540_v41  ;;  %v506_v47 = vrot.slane %v505_v42, 1 }
  0xd8   :  { %681 = vpow2.f32 %v543_v46  ;;  %v507_v50 = vadd.f32 %v506_v47, %v505_v42 }
  0xd9   :  { %v628_v52 = vpop.f32.mrb[0].mxu0  ;;  %v640_v53 = vpop.f32.mrb[0].mxu1 }
  0xda   :  { %v538_v54 = vsel %vm537_vm8, %v536_v51, %v507_v50  ;;  %v182_v55 = vadd.f32 %v628_v52, %v581_v48  ;;  %v222_v56 = vadd.f32 %v640_v53, %v581_v48  ;;  %v176_v57 = vpop.f32.mrb[1].mxu0  ;;  %v216_v58 = vpop.f32.mrb[1].mxu1 }
  0xdb   :  { %v539_v59 = vmul.f32 -0.5, %v538_v54  ;;  %v177_v60 = vadd.f32 %v581_v48, %v176_v57  ;;  %v217_v61 = vadd.f32 %v581_v48, %v216_v58 }
  0xdc   :  { %256 = vst [vmem:[#allocation2 + $0x8] sm:$0xff] %v182_v55  ;;  %264 = vst [vmem:[#allocation2 + $0x48] sm:$0xff] %v222_v56 }
  0xdd   :  { %v541_v62 = vmul.f32 1.442695, %v539_v59  ;;  %255 = vst [vmem:[#allocation2] sm:$0xff] %v177_v60  ;;  %263 = vst [vmem:[#allocation2 + $0x40] sm:$0xff] %v217_v61  ;;  %v631_v63 = vpop.f32.mrb[2].mxu0  ;;  %v643_v0 = vpop.f32.mrb[2].mxu1 }
  0xde   :  { %v192_v1 = vadd.f32 %v631_v63, %v581_v48  ;;  %v232_v2 = vadd.f32 %v643_v0, %v581_v48  ;;  %v186_v3 = vpop.f32.mrb[3].mxu0  ;;  %v226_v4 = vpop.f32.mrb[3].mxu1 }
  0xdf   :  { %683 = vpow2.f32 %v541_v62  ;;  %v187_v6 = vadd.f32 %v581_v48, %v186_v3  ;;  %v227_v7 = vadd.f32 %v581_v48, %v226_v4 }
  0xe0   :  { %258 = vst [vmem:[#allocation2 + $0x18] sm:$0xff] %v192_v1  ;;  %266 = vst [vmem:[#allocation2 + $0x58] sm:$0xff] %v232_v2 }
  0xe1   :  { %257 = vst [vmem:[#allocation2 + $0x10] sm:$0xff] %v187_v6  ;;  %265 = vst [vmem:[#allocation2 + $0x50] sm:$0xff] %v227_v7  ;;  %v634_v8 = vpop.f32.mrb[4].mxu0  ;;  %v646_v9 = vpop.f32.mrb[4].mxu1 }
  0xe2   :  { %v682_v10 = vpop.eup %681  ;;  %v202_v11 = vadd.f32 %v634_v8, %v581_v48  ;;  %v242_v12 = vadd.f32 %v646_v9, %v581_v48  ;;  %v196_v5 = vpop.f32.mrb[5].mxu0 }
  0xe3   :  { %v236_v13 = vpop.f32.mrb[5].mxu1  ;;  %v197_v14 = vadd.f32 %v581_v48, %v196_v5  ;;  %548 = vst.msk [vmem:[#allocation4 + $0x8] sm:$0x1] %vm547_vm9, %v682_v10 }
  0xe4   :  { %v237_v15 = vadd.f32 %v581_v48, %v236_v13  ;;  %260 = vst [vmem:[#allocation2 + $0x28] sm:$0xff] %v202_v11  ;;  %268 = vst [vmem:[#allocation2 + $0x68] sm:$0xff] %v242_v12 }
  0xe5   :  { %259 = vst [vmem:[#allocation2 + $0x20] sm:$0xff] %v197_v14  ;;  %v637_v16 = vpop.f32.mrb[6].mxu0 }
  0xe6   :  { %267 = vst [vmem:[#allocation2 + $0x60] sm:$0xff] %v237_v15  ;;  %v212_v17 = vadd.f32 %v637_v16, %v581_v48  ;;  %v649_v18 = vpop.f32.mrb[6].mxu1  ;;  %v206_v19 = vpop.f32.mrb[7].mxu0 }
  0xe7   :  { %v252_v20 = vadd.f32 %v649_v18, %v581_v48  ;;  %v207_v21 = vadd.f32 %v581_v48, %v206_v19  ;;  %v246_v22 = vpop.f32.mrb[7].mxu1 }
  0xe8   :  { %262 = vst [vmem:[#allocation2 + $0x38] sm:$0xff] %v212_v17  ;;  %v247_v23 = vadd.f32 %v581_v48, %v246_v22 }
  0xe9   :  { %v684_v24 = vpop.eup %683  ;;  %270 = vst [vmem:[#allocation2 + $0x78] sm:$0xff] %v252_v20  ;;  %261 = vst [vmem:[#allocation2 + $0x30] sm:$0xff] %v207_v21 }
  0xea   :  { %269 = vst [vmem:[#allocation2 + $0x70] sm:$0xff] %v247_v23  ;;  %546 = vst.msk [vmem:[#allocation4] sm:$0xff] %vm545_vm10, %v684_v24 }
  0xeb   :  { %696 = shalt.err (!%p693_p4)
}
  0xec   :  { %s697_s25 = scalar_lea.hbm %s964_s8, 2048 }
  0xed   :  { %p698_p5 = scmp.ne.s32.totalorder %s964_s8, %s697_s25  ;;  %p701_p6 = scmp.lt.u32.totalorder %s697_s25, %s964_s8 }
  0xef   :  { %p703_p7 = pnand %p701_p6, %p698_p5 }
  0xf1   :  { %706 = shalt.err (!%p703_p7)
}
  0xf2   :  { %s738_s29 = smov 128   ;;  %s739_s30 = smov 8  }
  0xf3   :  { %560 = dma.vmem_to_hbm [thread:$0]  %s555_s20, 2048, %s964_s8, [#allocation3], %s738_s29, %s738_s29, %s739_s30  }
  0xf4   :  { %s707_s12 = scalar_lea.vmem %s925_s21, 256  ;;  %p712_p9 = scmp.lt.s32.totalorder %s925_s21, %s925_s21 }
  0xf5   :  { %p708_p8 = scmp.ne.s32.totalorder %s925_s21, %s707_s12  ;;  %p713_p10 = scmp.lt.s32.totalorder %s707_s12, %s707_s12 }
  0xf7   :  { %p714_p11 = por %p713_p10, %p712_p9 }
  0xf9   :  { %p715_p12 = pnand %p714_p11, %p708_p8 }
  0xfb   :  { %718 = shalt.err (!%p715_p12)
}
  0xfc   :  { %s719_s14 = scalar_lea.hbm %s965_s9, 256 }
  0xfd   :  { %p720_p13 = scmp.ne.s32.totalorder %s965_s9, %s719_s14  ;;  %p723_p0 = scmp.lt.u32.totalorder %s719_s14, %s965_s9 }
  0xff   :  { %p725_p1 = pnand %p723_p0, %p720_p13 }
 0x101   :  { %728 = shalt.err (!%p725_p1)
}
 0x102   :  { %572 = dma.vmem_to_hbm [thread:$0]  %s925_s21, 256, %s965_s9, [#allocation5], %s738_s29, %s738_s29, %s739_s30  }
 0x103   :  { %729 = dma.done.wait [#allocation3], 2048  }
 0x104   :  { %730 = vsyncadd [#allocation3], 4294965248 }
 0x105   :  { %731 = dma.done.wait [#allocation5], 256  }
 0x106   :  { %732 = vsyncadd [#allocation5], 4294967040 }
 0x107   :  { %579 = vsyncpa [#allocation3], 1 }
 0x108   :  { %580 = vsyncpa [#allocation5], 1 }

</bundles_post_ra>
